<compile_context>
chip_gen: v6e
topology: v6e:2x2x1
jax: 0.10.0
libtpu: 0.0.40
codegen_flags: <defaults>
</compile_context>

<pallas_src>
import math

import jax
import jax.numpy as jnp
from jax import lax
from jax.experimental import pallas as pl
from jax.experimental.pallas import tpu as pltpu


# ---------------------------------------------------------------------------
# Parameter packing: every tensor raveled into one (rows, _LANES) buffer.
# ---------------------------------------------------------------------------
_LANES = 512            # lane-dense: large multiple of 128 -> unmasked vst
_MAX_BLOCK_ROWS = 1024  # 1024x512 fp32 block = 2 MiB/operand/pipeline buffer
                        # (3 streams x 2 buffers = 12 MiB, < 32 MiB scoped VMEM)


def _padded_rows(total_elems):
    rows = max(8, -(-total_elems // _LANES))
    rows = -(-rows // 8) * 8                       # sublane-dense (multiple of 8)
    if rows > _MAX_BLOCK_ROWS:                     # make the row-block divide evenly
        rows = -(-rows // _MAX_BLOCK_ROWS) * _MAX_BLOCK_ROWS
    return rows


def pack_params(params):
    """Concatenate all parameter tensors into a single (rows, _LANES) buffer."""
    keys = sorted(params)
    dtypes = {params[k].dtype for k in keys}
    assert len(dtypes) == 1, "demo assumes a single parameter dtype"
    shapes = {k: params[k].shape for k in keys}
    sizes = {k: int(math.prod(params[k].shape)) for k in keys}
    total = sum(sizes.values())
    rows = _padded_rows(total)
    flat = jnp.concatenate([jnp.ravel(params[k]) for k in keys])
    flat = jnp.pad(flat, (0, rows * _LANES - total))
    return flat.reshape(rows, _LANES), (keys, shapes, sizes)


def unpack_params(buf, meta):
    keys, shapes, sizes = meta
    flat = buf.reshape(-1)
    out, off = {}, 0
    for k in keys:
        out[k] = flat[off:off + sizes[k]].reshape(shapes[k])
        off += sizes[k]
    return out


# ---------------------------------------------------------------------------
# Kernel 1: fused SWA / EMA parameter update (swa_avg_fn) over the flat buffer
# ---------------------------------------------------------------------------
def _ema_kernel(decay_ref, avg_ref, p_ref, out_ref):
    one_minus_decay = jnp.float32(1.0) - decay_ref[0]       # SMEM scalar read
    avg = avg_ref[...].astype(jnp.float32)
    p = p_ref[...].astype(jnp.float32)
    out_ref[...] = (avg + (p - avg) * one_minus_decay).astype(out_ref.dtype)


def fused_ema_update(avg_buf, param_buf, decay_rate):
    """One AveragedModel.update_parameters EMA step over ALL params at once."""
    rows, lanes = avg_buf.shape
    block_rows = rows if rows <= _MAX_BLOCK_ROWS else _MAX_BLOCK_ROWS
    grid = (rows // block_rows,)
    decay = jnp.asarray([decay_rate], dtype=jnp.float32)
    tile = pl.BlockSpec((block_rows, lanes), lambda i: (i, 0))
    return pl.pallas_call(
        _ema_kernel,
        out_shape=jax.ShapeDtypeStruct(avg_buf.shape, avg_buf.dtype),
        grid=grid,
        in_specs=[
            pl.BlockSpec(memory_space=pltpu.MemorySpace.SMEM),  # decay scalar
            tile,                                               # averaged params
            tile,                                               # model params
        ],
        out_specs=tile,
        # in-place update: alias the averaged buffer (input 1) to the output
        input_output_aliases={1: 0},
        compiler_params=pltpu.CompilerParams(
            dimension_semantics=("parallel",),
            vmem_limit_bytes=32 * 1024 * 1024),
    )(decay, avg_buf, param_buf)


# ---------------------------------------------------------------------------
# Kernel 2: forward of the averaged model (stand-in linear head, tiled matmul)
# ---------------------------------------------------------------------------
def _linear_kernel(x_ref, w_ref, b_ref, o_ref, acc_ref):
    @pl.when(pl.program_id(2) == 0)
    def _init():
        acc_ref[...] = jnp.zeros_like(acc_ref)

    # y = x @ W^T : contract x dim 1 with W dim 1 (no wrapper-side transpose).
    acc_ref[...] += lax.dot_general(
        x_ref[...], w_ref[...],
        dimension_numbers=(((1,), (1,)), ((), ())),
        preferred_element_type=jnp.float32)

    @pl.when(pl.program_id(2) == pl.num_programs(2) - 1)
    def _finalize():
        o_ref[...] = (acc_ref[...] + b_ref[...].astype(jnp.float32)
                      ).astype(o_ref.dtype)


def _pick_tile(dim, target, align):
    if dim <= target:
        return dim                      # full extent (valid for any size)
    if dim % target == 0:
        return target
    for t in range(target, align - 1, -align):
        if dim % t == 0:
            return t
    return dim


def linear_forward(x, weight, bias):
    """y = x @ weight.T + bias  (weight passed un-transposed, (d_out, d_in))."""
    M, K = x.shape
    N, K2 = weight.shape
    assert K == K2
    b2 = bias.reshape(1, N)
    tm = _pick_tile(M, 128, 8)
    tn = _pick_tile(N, 256, 128)   # 256-aligned lanes when N is large
    tk = _pick_tile(K, 512, 128)
    grid = (M // tm, N // tn, K // tk)
    # TODO(synk): at real AlphaFold-head sizes, pad d_out to a multiple of 128
    # for unmasked lane-dense stores; the toy d_out=32 stays un-padded here.
    return pl.pallas_call(
        _linear_kernel,
        out_shape=jax.ShapeDtypeStruct((M, N), x.dtype),
        grid=grid,
        in_specs=[
            pl.BlockSpec((tm, tk), lambda i, j, k: (i, k)),
            pl.BlockSpec((tn, tk), lambda i, j, k: (j, k)),
            pl.BlockSpec((1, tn), lambda i, j, k: (0, j)),
        ],
        out_specs=pl.BlockSpec((tm, tn), lambda i, j, k: (i, j)),
        scratch_shapes=[pltpu.VMEM((tm, tn), jnp.float32)],
        compiler_params=pltpu.CompilerParams(
            dimension_semantics=("parallel", "parallel", "arbitrary"),
            vmem_limit_bytes=32 * 1024 * 1024),
    )(x, weight, b2)


# ---------------------------------------------------------------------------
# AlphaFoldSWA wrapper (JAX version of the PyTorch module)
# ---------------------------------------------------------------------------
class AlphaFoldSWA:
    """SWA wrapper holding EMA-averaged parameters of a (synthetic) model."""

    def __init__(self, model_params, enabled: bool, decay_rate: float):
        if enabled:
            # AveragedModel deep-copies parameters at construction, n_averaged = 0.
            flat, meta = pack_params(model_params)
            self._avg_flat = flat
            self._meta = meta
            self.n_averaged = 0
            self.decay_rate = float(decay_rate)
            self.enabled = True
        else:
            self._avg_flat = None
            self.enabled = False

    def update(self, model_params):
        if not self.enabled:
            return
        p_flat, _ = pack_params(model_params)
        if self.n_averaged == 0:
            # AveragedModel copies on the first update; decided on the host so
            # no kernel launch and no wasted DMA of the stale average.
            self._avg_flat = p_flat
        else:
            self._avg_flat = fused_ema_update(
                self._avg_flat, p_flat, self.decay_rate)
        self.n_averaged += 1

    @property
    def averaged_params(self):
        return unpack_params(self._avg_flat, self._meta)

    def forward(self, batch):
        if not self.enabled:
            raise RuntimeError("AlphaFoldSWA is not enabled")
        # TODO(synk): the real AlphaFold forward (Evoformer/structure module) is
        # not part of the given module; a linear head stands in for it here.
        params = self.averaged_params
        return linear_forward(batch, params["weight"], params["bias"])

    __call__ = forward


# ---------------------------------------------------------------------------
if __name__ == "__main__":
    key = jax.random.PRNGKey(0)
    k_w, k_b, k_w2, k_b2, k_x = jax.random.split(key, 5)

    d_in, d_out, batch_size = 32, 32, 8
    decay_rate = 0.9

    # "AlphaFold" model parameters at two training steps (deterministic init).
    params_t0 = {
        "weight": jax.random.normal(k_w, (d_out, d_in), dtype=jnp.float32) * 0.1,
        "bias": jax.random.normal(k_b, (d_out,), dtype=jnp.float32) * 0.1,
    }
    params_t1 = {
        "weight": params_t0["weight"]
        + 0.01 * jax.random.normal(k_w2, (d_out, d_in), dtype=jnp.float32),
        "bias": params_t0["bias"]
        + 0.01 * jax.random.normal(k_b2, (d_out,), dtype=jnp.float32),
    }

    x = jax.random.normal(k_x, (batch_size, d_in), dtype=jnp.float32)

    swa = AlphaFoldSWA(params_t0, enabled=True, decay_rate=decay_rate)
    swa.update(params_t0)   # n_averaged == 0 -> host-side copy path
    swa.update(params_t1)   # n_averaged == 1 -> fused Pallas EMA kernel

    out = swa(x)
    out = jax.block_until_ready(out)

    # Pure-JAX reference for correctness.
    ref_w = params_t0["weight"] + (params_t1["weight"] - params_t0["weight"]) * (1.0 - decay_rate)
    ref_b = params_t0["bias"] + (params_t1["bias"] - params_t0["bias"]) * (1.0 - decay_rate)
    ref_out = x @ ref_w.T + ref_b

    avg = swa.averaged_params
    assert jnp.allclose(avg["weight"], ref_w, atol=1e-6), "weight EMA mismatch"
    assert jnp.allclose(avg["bias"], ref_b, atol=1e-6), "bias EMA mismatch"
    assert jnp.allclose(out, ref_out, atol=1e-5), "forward mismatch"

    print("KERNEL_OK")
</pallas_src>

<mosaic_0001>
module attributes {stable_mosaic.version = 11 : i64} {
  func.func @_ema_kernel(%arg0: i32, %arg1: memref<1xf32, #tpu.memory_space<smem>>, %arg2: memref<8x512xf32, #tpu.memory_space<vmem>>, %arg3: memref<8x512xf32, #tpu.memory_space<vmem>>, %arg4: memref<8x512xf32, #tpu.memory_space<vmem>>) attributes {dimension_semantics = [#tpu.dimension_semantics<parallel>], iteration_bounds = array<i64: 1>, scalar_prefetch = 0 : i64, scratch_operands = 0 : i64, tpu.core_type = #tpu.core_type<tc>, window_params = [{transform_indices = @transform_0, window_bounds = array<i64: 1>}, {transform_indices = @transform_1, window_bounds = array<i64: 8, 512>}, {transform_indices = @transform_2, window_bounds = array<i64: 8, 512>}, {transform_indices = @transform_3, window_bounds = array<i64: 8, 512>}]} {
    %c0 = arith.constant 0 : index
    %0 = memref.load %arg1[%c0] : memref<1xf32, #tpu.memory_space<smem>>
    %cst = arith.constant 1.000000e+00 : f32
    %1 = arith.subf %cst, %0 : f32
    %c0_0 = arith.constant 0 : index
    %c0_1 = arith.constant 0 : index
    %2 = vector.load %arg2[%c0_0, %c0_1] : memref<8x512xf32, #tpu.memory_space<vmem>>, vector<8x512xf32>
    %c0_2 = arith.constant 0 : index
    %c0_3 = arith.constant 0 : index
    %3 = vector.load %arg3[%c0_2, %c0_3] : memref<8x512xf32, #tpu.memory_space<vmem>>, vector<8x512xf32>
    %4 = arith.subf %3, %2 : vector<8x512xf32>
    %5 = vector.broadcast %1 : f32 to vector<8x512xf32>
    %6 = arith.mulf %4, %5 : vector<8x512xf32>
    %7 = arith.addf %2, %6 : vector<8x512xf32>
    %c0_4 = arith.constant 0 : index
    %c0_5 = arith.constant 0 : index
    %8 = vector.load %arg4[%c0_4, %c0_5] : memref<8x512xf32, #tpu.memory_space<vmem>>, vector<8x512xf32>
    tpu.vector_store %arg4[%c0_4, %c0_5], %7 {strides = array<i32>} : memref<8x512xf32, #tpu.memory_space<vmem>>, vector<8x512xf32>,
    return
  }
  func.func @transform_0(%arg0: i32) -> i32 {
    %c0_i32 = arith.constant 0 : i32
    %c0_i32_0 = arith.constant 0 : i32
    return %c0_i32 : i32
  }
  func.func @transform_1(%arg0: i32) -> (i32, i32) {
    %c0_i32 = arith.constant 0 : i32
    %c0_i32_0 = arith.constant 0 : i32
    return %arg0, %c0_i32 : i32, i32
  }
  func.func @transform_2(%arg0: i32) -> (i32, i32) {
    %c0_i32 = arith.constant 0 : i32
    %c0_i32_0 = arith.constant 0 : i32
    return %arg0, %c0_i32 : i32, i32
  }
  func.func @transform_3(%arg0: i32) -> (i32, i32) {
    %c0_i32 = arith.constant 0 : i32
    %c0_i32_0 = arith.constant 0 : i32
    return %arg0, %c0_i32 : i32, i32
  }
}

</mosaic_0001>

<bundles_post_ra>
// kernel: tpu_custom_call.1
= control target key start
LH: loop header
LB: loop body
LE: loop exit
PB: predicated region body
PF: predicated region fallthrough
CT: control target
= control target key end

     0   :  { %9 = vsyncpa [#allocation4], 0  ;;  %s159_s0 = inlined_call_operand.<no memory space> [shape: f32[1], index: 0, kind: input, shape index: {}]   ;;  %s160_s1 = inlined_call_operand.hbm [shape: f32[8,512], index: 1, kind: input, shape index: {}, may-alias: {1,3}]   ;;  %s161_s2 = inlined_call_operand.vmem [shape: f32[8,512], index: 2, kind: input, shape index: {}]   ;;  %s162_s3 = inlined_call_operand.hbm [shape: f32[8,512], index: 3, kind: output, shape index: {}, may-alias: {1,3}]  }
   0x1   :  { %10 = vsyncpa [#allocation5], 0  ;;  %s116_s12 = smov [#allocation3]  }
   0x2   :  { %s19_s13 = sshll.u32 %s116_s12, 4  ;;  %s20_s13 = int_to_ptr.vmem [resolvable:$true] %s19_s13 }
   0x3   :  { %s80_s14 = scalar_lea.vmem %s20_s13, 512  ;;  %p85_p1 = scmp.lt.s32.totalorder %s20_s13, %s20_s13 }
   0x4   :  { %p81_p0 = scmp.ne.s32.totalorder %s20_s13, %s80_s14  ;;  %p86_p2 = scmp.lt.s32.totalorder %s80_s14, %s80_s14 }
   0x6   :  { %p87_p3 = por %p86_p2, %p85_p1 }
   0x8   :  { %p88_p4 = pnand %p87_p3, %p81_p0 }
   0xa   :  { %91 = shalt.err (!%p88_p4)
}
   0xb   :  { %22 = dma.hbm_to_vmem [thread:$0]  %s160_s1, 512, %s20_s13, [#allocation4]  }
   0xc   :  { %112 = dma.done.wait [#allocation4], 512  }
   0xd   :  { %113 = vsyncadd [#allocation4], 4294966784  ;;  %s29_s19 = ssub.f32 1.0, %s159_s0  ;;  %v30_v0 = vld [vmem:[#allocation3] sm:$0xff]  ;;  %v31_v3 = vld [vmem:[#allocation3 + $0x8] sm:$0xff]  ;;  %s117_s26 = smov [#allocation6]  }
   0xe   :  { %v34_v1 = vld [vmem:[%s161_s2] sm:$0xff]  ;;  %v35_v5 = vld [vmem:[%s161_s2 + $0x8] sm:$0xff]  ;;  %v32_v6 = vld [vmem:[#allocation3 + $0x10] sm:$0xff]  ;;  %s61_s27 = sshll.u32 %s117_s26, 4  ;;  %s62_s27 = int_to_ptr.vmem [resolvable:$true] %s61_s27 }
   0xf   :  { %v42_v2 = vstv %s29_s19  ;;  %v38_v4 = vsub.f32 %v34_v1, %v30_v0  ;;  %v36_v7 = vld [vmem:[%s161_s2 + $0x10] sm:$0xff]  ;;  %v39_v8 = vsub.f32 %v35_v5, %v31_v3  ;;  %v33_v10 = vld [vmem:[#allocation3 + $0x18] sm:$0xff]  ;;  %s92_s28 = scalar_lea.vmem %s62_s27, 512  ;;  %p97_p6 = scmp.lt.s32.totalorder %s62_s27, %s62_s27 }
  0x10   :  { %v40_v9 = vsub.f32 %v36_v7, %v32_v6  ;;  %v37_v11 = vld [vmem:[%s161_s2 + $0x18] sm:$0xff]  ;;  %p93_p5 = scmp.ne.s32.totalorder %s62_s27, %s92_s28  ;;  %p98_p7 = scmp.lt.s32.totalorder %s92_s28, %s92_s28 }
  0x11   :  { %v43_v12 = vmul.f32 %v42_v2, %v38_v4  ;;  %v41_v13 = vsub.f32 %v37_v11, %v33_v10  ;;  %v44_v14 = vmul.f32 %v42_v2, %v39_v8 }
  0x12   :  { %v45_v15 = vmul.f32 %v42_v2, %v40_v9  ;;  %p99_p8 = por %p98_p7, %p97_p6 }
  0x13   :  { %v47_v16 = vadd.f32 %v43_v12, %v30_v0  ;;  %v46_v17 = vmul.f32 %v42_v2, %v41_v13  ;;  %v48_v18 = vadd.f32 %v44_v14, %v31_v3 }
  0x14   :  { %v49_v19 = vadd.f32 %v45_v15, %v32_v6  ;;  %p100_p9 = pnand %p99_p8, %p93_p5 }
  0x15   :  { %51 = vst [vmem:[#allocation6] sm:$0xff] %v47_v16  ;;  %v50_v20 = vadd.f32 %v46_v17, %v33_v10  ;;  %52 = vst [vmem:[#allocation6 + $0x8] sm:$0xff] %v48_v18 }
  0x16   :  { %53 = vst [vmem:[#allocation6 + $0x10] sm:$0xff] %v49_v19 }
  0x17   :  { %54 = vst [vmem:[#allocation6 + $0x18] sm:$0xff] %v50_v20 }
  0x18   :  { %103 = shalt.err (!%p100_p9)
}
  0x19   :  { %64 = dma.vmem_to_hbm [thread:$0]  %s62_s27, 512, %s162_s3, [#allocation5]  }
  0x1a   :  { %114 = dma.done.wait [#allocation5], 512  }
  0x1b   :  { %115 = vsyncadd [#allocation5], 4294966784 }
  0x1c   :  { %68 = vsyncpa [#allocation4], 1 }
  0x1d   :  { %69 = vsyncpa [#allocation5], 1 }

</bundles_post_ra>
